<compile_context>
chip_gen: v6e
topology: v6e:2x2x1
jax: 0.10.0
libtpu: 0.0.40
codegen_flags: <defaults>
</compile_context>

<pallas_src>
import jax
import jax.numpy as jnp
from jax.experimental import pallas as pl
from jax.experimental.pallas import tpu as pltpu

LANE = 128
_SUBLANE_MIN = {4: 8, 2: 16, 1: 32}  # min sublane tiling per element width


# ----------------------------- kernel bodies --------------------------------

def _hardsigmoid_paddle_kernel(x_ref, o_ref):
    # clamp(1.2*x + 3, 0, 6) / 6  ==  clamp(0.2*x + 0.5, 0, 1)
    x = x_ref[...]
    o_ref[...] = jnp.clip(x * 0.2 + 0.5, 0.0, 1.0).astype(o_ref.dtype)


def _hardsigmoid_torch_kernel(x_ref, o_ref):
    # relu6(x + 3) / 6  ==  clamp(x/6 + 0.5, 0, 1)
    x = x_ref[...]
    o_ref[...] = jnp.clip(x * (1.0 / 6.0) + 0.5, 0.0, 1.0).astype(o_ref.dtype)


# ------------------------------ jnp fallback ---------------------------------

def _jnp_hard_sigmoid(x, hs_type):
    # Same folded math as the kernels; used for tiny tensors (launch overhead
    # dominates, XLA fuses this into neighbors) and for flat lengths that are
    # not a multiple of 128 (avoids a full-tensor pad copy + output slice copy
    # that would ~3x the HBM traffic of the kernel itself).
    if hs_type == "paddle":
        return jnp.clip(x * 0.2 + 0.5, 0.0, 1.0).astype(x.dtype)
    return jnp.clip(x * (1.0 / 6.0) + 0.5, 0.0, 1.0).astype(x.dtype)


# -------------------------------- wrapper ------------------------------------

def hard_sigmoid(x, hs_type="paddle", *, block_bytes=4 * 1024 * 1024,
                 min_pallas_bytes=256 * 1024, donate_input=False):
    """Elementwise HardSigmoid via a Pallas TPU kernel.

    donate_input: set True only when the caller actually donates `x` (e.g.
    jax.jit donate_argnums) — the output HBM buffer is then aliased onto the
    input.  This saves an HBM *allocation* only; the op still reads N bytes
    and writes N bytes.  For a real bandwidth win, fuse HardSigmoid into the
    producing conv/matmul epilogue instead of calling it standalone.
    """
    orig_shape = x.shape
    dtype = x.dtype
    total = x.size
    itemsize = jnp.dtype(dtype).itemsize
    nbytes = total * itemsize

    # Tiny tensors or non-lane-multiple flat lengths: fused jnp path
    # (same 2N-byte roofline, no pad/slice copies, no launch overhead).
    if total == 0 or nbytes < min_pallas_bytes or total % LANE != 0:
        return _jnp_hard_sigmoid(x, hs_type)

    # ---- lane-dense 2-D slab, no data movement -----------------------------
    rows = total // LANE
    x2d = jnp.reshape(x, (rows, LANE))  # contiguous reshape (bitcast)

    # ---- tiling -------------------------------------------------------------
    sub = _SUBLANE_MIN.get(itemsize, 8)
    row_bytes = LANE * itemsize
    block_rows = max(block_bytes // row_bytes, sub)
    block_rows = max((block_rows // 32) * 32, sub)  # multiple of every sublane min

    if rows > block_rows:
        tile_rows = block_rows
    else:
        # Fits in one block: still split into >=4 blocks so v7x's two
        # TensorCores both stream and input/output DMAs pipeline.
        tile_rows = -(-rows // 4)                 # cdiv(rows, 4)
        tile_rows = -(-tile_rows // 32) * 32      # round up to multiple of 32
        if tile_rows >= rows:
            tile_rows = rows                      # full-extent single block
    grid = (pl.cdiv(rows, tile_rows),)            # ragged last block is fine

    tile_bytes = tile_rows * row_bytes
    # in + out, double buffered, +10% slack; capped under every chip's scoped
    # VMEM budget (v5e/v6e/v7x).
    vmem_limit = min(max(int(4 * tile_bytes * 1.1), 4 * 1024 * 1024),
                     32 * 1024 * 1024)

    kernel = (_hardsigmoid_paddle_kernel if hs_type == "paddle"
              else _hardsigmoid_torch_kernel)

    out2d = pl.pallas_call(
        kernel,
        out_shape=jax.ShapeDtypeStruct((rows, LANE), dtype),
        grid_spec=pltpu.PrefetchScalarGridSpec(
            num_scalar_prefetch=0,
            grid=grid,
            in_specs=[pl.BlockSpec((tile_rows, LANE), lambda i: (i, 0))],
            out_specs=pl.BlockSpec((tile_rows, LANE), lambda i: (i, 0)),
        ),
        compiler_params=pltpu.CompilerParams(
            dimension_semantics=("parallel",),
            vmem_limit_bytes=vmem_limit,
        ),
        cost_estimate=pl.CostEstimate(
            flops=2 * total,
            transcendentals=0,
            bytes_accessed=2 * nbytes,
        ),
        input_output_aliases={0: 0} if donate_input else {},
    )(x2d)

    return out2d.reshape(orig_shape)


# ------------------------------- reference -----------------------------------

def _ref_hard_sigmoid(x, hs_type="paddle"):
    if hs_type == "paddle":
        return jnp.clip(1.2 * x + 3.0, 0.0, 6.0) / 6.0
    return jnp.clip(x + 3.0, 0.0, 6.0) / 6.0


if __name__ == "__main__":
    key = jax.random.PRNGKey(0)

    # 1) Small NCHW input, shaped like the module's conv activation.
    #    Default path routes this through the fused-jnp fallback; also force
    #    it through the Pallas kernel (min_pallas_bytes=0) to check the
    #    single full-extent block path.
    x = jax.random.normal(key, (2, 4, 16, 16), dtype=jnp.float32) * 4.0
    y_small = jax.block_until_ready(hard_sigmoid(x, "paddle"))
    y_small_pl = jax.block_until_ready(
        hard_sigmoid(x, "paddle", min_pallas_bytes=0))
    y_small_torch = jax.block_until_ready(
        hard_sigmoid(x, "torch", min_pallas_bytes=0))
    assert y_small.shape == x.shape and y_small.dtype == x.dtype
    assert jnp.allclose(y_small, _ref_hard_sigmoid(x, "paddle"), atol=1e-6, rtol=1e-6)
    assert jnp.allclose(y_small_pl, _ref_hard_sigmoid(x, "paddle"), atol=1e-6, rtol=1e-6)
    assert jnp.allclose(y_small_torch, _ref_hard_sigmoid(x, "torch"), atol=1e-6, rtol=1e-6)

    # 2) Medium tensor: exercises the >=4-step parallel grid / pipelined path.
    x_med = jax.random.normal(jax.random.PRNGKey(1), (2, 32, 64, 128),
                              dtype=jnp.float32) * 4.0
    y_med = jax.block_until_ready(hard_sigmoid(x_med, "paddle"))
    assert y_med.shape == x_med.shape
    assert jnp.allclose(y_med, _ref_hard_sigmoid(x_med, "paddle"), atol=1e-6, rtol=1e-6)

    # 3) Ragged-grid Pallas path (rows not a multiple of tile_rows).
    x_rag = jax.random.normal(jax.random.PRNGKey(2), (1, 3, 100, 128),
                              dtype=jnp.float32) * 4.0
    y_rag = jax.block_until_ready(
        hard_sigmoid(x_rag, "paddle", min_pallas_bytes=0))
    assert jnp.allclose(y_rag, _ref_hard_sigmoid(x_rag, "paddle"), atol=1e-6, rtol=1e-6)

    # 4) Non-multiple-of-128 flat length: routed to the fused jnp fallback
    #    (no pad/slice copies).
    x_awk = jax.random.normal(jax.random.PRNGKey(3), (3, 7, 181, 181),
                              dtype=jnp.float32) * 4.0
    y_awk = jax.block_until_ready(hard_sigmoid(x_awk, "paddle"))
    assert y_awk.shape == x_awk.shape
    assert jnp.allclose(y_awk, _ref_hard_sigmoid(x_awk, "paddle"), atol=1e-6, rtol=1e-6)

    print("KERNEL_OK")
</pallas_src>

<mosaic_0001>
module attributes {stable_mosaic.version = 11 : i64} {
  func.func @_hardsigmoid_paddle_kernel(%arg0: i32, %arg1: memref<16x128xf32, #tpu.memory_space<vmem>>, %arg2: memref<16x128xf32, #tpu.memory_space<vmem>>) attributes {dimension_semantics = [#tpu.dimension_semantics<parallel>], iteration_bounds = array<i64: 1>, scalar_prefetch = 0 : i64, scratch_operands = 0 : i64, tpu.core_type = #tpu.core_type<tc>, window_params = [{transform_indices = @transform_0, window_bounds = array<i64: 16, 128>}, {transform_indices = @transform_1, window_bounds = array<i64: 16, 128>}]} {
    %c0 = arith.constant 0 : index
    %c0_0 = arith.constant 0 : index
    %0 = vector.load %arg1[%c0, %c0_0] : memref<16x128xf32, #tpu.memory_space<vmem>>, vector<16x128xf32>
    %cst = arith.constant 2.000000e-01 : f32
    %1 = vector.broadcast %cst : f32 to vector<16x128xf32>
    %2 = arith.mulf %0, %1 : vector<16x128xf32>
    %cst_1 = arith.constant 5.000000e-01 : f32
    %3 = vector.broadcast %cst_1 : f32 to vector<16x128xf32>
    %4 = arith.addf %2, %3 : vector<16x128xf32>
    %cst_2 = arith.constant 0.000000e+00 : f32
    %cst_3 = arith.constant 1.000000e+00 : f32
    %5 = vector.broadcast %cst_2 : f32 to vector<16x128xf32>
    %6 = arith.maximumf %5, %4 : vector<16x128xf32>
    %7 = vector.broadcast %cst_3 : f32 to vector<16x128xf32>
    %8 = arith.minimumf %7, %6 : vector<16x128xf32>
    %c0_4 = arith.constant 0 : index
    %c0_5 = arith.constant 0 : index
    %9 = vector.load %arg2[%c0_4, %c0_5] : memref<16x128xf32, #tpu.memory_space<vmem>>, vector<16x128xf32>
    tpu.vector_store %arg2[%c0_4, %c0_5], %8 {strides = array<i32>} : memref<16x128xf32, #tpu.memory_space<vmem>>, vector<16x128xf32>,
    return
  }
  func.func @transform_0(%arg0: i32) -> (i32, i32) {
    %c0_i32 = arith.constant 0 : i32
    %c0_i32_0 = arith.constant 0 : i32
    return %arg0, %c0_i32 : i32, i32
  }
  func.func @transform_1(%arg0: i32) -> (i32, i32) {
    %c0_i32 = arith.constant 0 : i32
    %c0_i32_0 = arith.constant 0 : i32
    return %arg0, %c0_i32 : i32, i32
  }
}

</mosaic_0001>

<bundles_post_ra>
// kernel: tpu_custom_call.1
= control target key start
LH: loop header
LB: loop body
LE: loop exit
PB: predicated region body
PF: predicated region fallthrough
CT: control target
= control target key end

     0   :  { %6 = vsyncpa [#allocation3], 0  ;;  %s126_s0 = inlined_call_operand.hbm [shape: f32[16,128], index: 0, kind: input, shape index: {}]   ;;  %s127_s1 = inlined_call_operand.hbm [shape: f32[16,128], index: 1, kind: output, shape index: {}]  }
   0x1   :  { %7 = vsyncpa [#allocation4], 0  ;;  %s100_s6 = smov [#allocation2]  }
   0x2   :  { %s13_s7 = sshll.u32 %s100_s6, 4  ;;  %s14_s7 = int_to_ptr.vmem [resolvable:$true] %s13_s7 }
   0x3   :  { %s64_s8 = scalar_lea.vmem %s14_s7, 256  ;;  %p69_p1 = scmp.lt.s32.totalorder %s14_s7, %s14_s7 }
   0x4   :  { %p65_p0 = scmp.ne.s32.totalorder %s14_s7, %s64_s8  ;;  %p70_p2 = scmp.lt.s32.totalorder %s64_s8, %s64_s8 }
   0x6   :  { %p71_p3 = por %p70_p2, %p69_p1 }
   0x8   :  { %p72_p4 = pnand %p71_p3, %p65_p0 }
   0xa   :  { %75 = shalt.err (!%p72_p4)
}
   0xb   :  { %s101_s9 = smov 128   ;;  %s102_s10 = smov 8  }
   0xc   :  { %19 = dma.hbm_to_vmem [thread:$0]  %s126_s0, 256, %s14_s7, [#allocation3], %s101_s9, %s101_s9, %s102_s10  }
   0xd   :  { %96 = dma.done.wait [#allocation3], 256  }
   0xe   :  { %97 = vsyncadd [#allocation3], 4294967040  ;;  %v23_v0 = vld [vmem:[#allocation2] sm:$0xff]  ;;  %v24_v1 = vld [vmem:[#allocation2 + $0x8] sm:$0xff]  ;;  %s103_s13 = smov [#allocation5]  }
   0xf   :  { %v25_v2 = vmul.f32 0.2, %v23_v0  ;;  %v26_v3 = vmul.f32 0.2, %v24_v1  ;;  %s40_s14 = sshll.u32 %s103_s13, 4  ;;  %s41_s14 = int_to_ptr.vmem [resolvable:$true] %s40_s14 }
  0x10   :  { %s76_s15 = scalar_lea.vmem %s41_s14, 256  ;;  %p81_p6 = scmp.lt.s32.totalorder %s41_s14, %s41_s14 }
  0x11   :  { %v27_v4 = vadd.f32 0.5, %v25_v2  ;;  %v28_v5 = vadd.f32 0.5, %v26_v3  ;;  %p77_p5 = scmp.ne.s32.totalorder %s41_s14, %s76_s15  ;;  %p82_p7 = scmp.lt.s32.totalorder %s76_s15, %s76_s15 }
  0x13   :  { %v29_v6 = vmax.f32 %v27_v4, 0.0  ;;  %v30_v7 = vmax.f32 %v28_v5, 0.0  ;;  %p83_p8 = por %p82_p7, %p81_p6 }
  0x15   :  { %v31_v8 = vmin.f32 %v29_v6, 1.0  ;;  %v32_v9 = vmin.f32 %v30_v7, 1.0  ;;  %p84_p9 = pnand %p83_p8, %p77_p5 }
  0x17   :  { %33 = vst [vmem:[#allocation5] sm:$0xff] %v31_v8  ;;  %34 = vst [vmem:[#allocation5 + $0x8] sm:$0xff] %v32_v9 }
  0x18   :  { %87 = shalt.err (!%p84_p9)
}
  0x19   :  { %46 = dma.vmem_to_hbm [thread:$0]  %s41_s14, 256, %s127_s1, [#allocation4], %s101_s9, %s101_s9, %s102_s10  }
  0x1a   :  { %98 = dma.done.wait [#allocation4], 256  }
  0x1b   :  { %99 = vsyncadd [#allocation4], 4294967040 }
  0x1c   :  { %50 = vsyncpa [#allocation3], 1 }
  0x1d   :  { %51 = vsyncpa [#allocation4], 1 }

</bundles_post_ra>
